<compile_context>
chip_gen: v7x
topology: tpu7x:2x2x1
jax: 0.10.0
libtpu: 0.0.40
codegen_flags: <defaults>
</compile_context>

<pallas_src>
import jax
import jax.numpy as jnp
from jax.experimental import pallas as pl
from jax.experimental.pallas import tpu as pltpu

_LANE = 128
_SUBLANE = 8
_DEFAULT_MAX_TILE_ROWS = 2048   # (2048, 128) f32 block = 1 MiB / stream / buffer


def _cdiv(a: int, b: int) -> int:
    return -(-a // b)


def _round_up(x: int, m: int) -> int:
    return ((x + m - 1) // m) * m


def _make_mcc_partials_kernel(tile_rows: int, inner: int, rows_full: int, lane_rem: int):
    """Build the partial-sum kernel with all tiling constants closed over (static)."""

    def kernel(p_ref, t_ref, acc_ref):
        # acc_ref: (3, 8, 128) f32 output block, resident across the inner
        # ("arbitrary") grid axis.  Row 0: sum sigmoid(p); 1: sum t; 2: sum p*t.
        c = pl.program_id(0)
        i = pl.program_id(1)

        @pl.when(i == 0)
        def _():
            acc_ref[...] = jnp.zeros_like(acc_ref)

        # Logical (unclamped) block index / global row offset of this grid step.
        block = c * inner + i
        row_base = block * tile_rows

        def accumulate(p, t):
            # (tile_rows, 128) -> (8, 128): vreg-aligned reshape + adds over the
            # leading axis (pure VALU, no cross-lane work), then one small RMW per
            # tile into the resident accumulator block.
            acc_ref[0] += jnp.sum(p.reshape(-1, _SUBLANE, _LANE), axis=0)
            acc_ref[1] += jnp.sum(t.reshape(-1, _SUBLANE, _LANE), axis=0)
            acc_ref[2] += jnp.sum((p * t).reshape(-1, _SUBLANE, _LANE), axis=0)

        # Fast path: every element of this block is valid (no masking needed).
        fully_valid = (row_base + tile_rows) <= rows_full

        @pl.when(fully_valid)
        def _():
            p = jax.nn.sigmoid(p_ref[...].astype(jnp.float32))
            t = t_ref[...].astype(jnp.float32)
            accumulate(p, t)

        # Tail path: runs for at most one block per core (plus any fully-masked
        # duplicate block from index_map clamping).  Garbage rows beyond the array
        # edge and lane-tail padding contribute exactly zero.
        @pl.when(jnp.logical_not(fully_valid))
        def _():
            row_iota = jax.lax.broadcasted_iota(jnp.int32, (tile_rows, _LANE), 0)
            grow = row_base + row_iota
            if lane_rem:
                lane_iota = jax.lax.broadcasted_iota(jnp.int32, (tile_rows, _LANE), 1)
                mask = (grow < rows_full) | ((grow == rows_full) & (lane_iota < lane_rem))
            else:
                mask = grow < rows_full
            p = jnp.where(mask, jax.nn.sigmoid(p_ref[...].astype(jnp.float32)), 0.0)
            t = jnp.where(mask, t_ref[...].astype(jnp.float32), 0.0)
            accumulate(p, t)

    return kernel


def mcc_loss(y_pred, y_true, eps: float = 1e-5, max_tile_rows: int = _DEFAULT_MAX_TILE_ROWS):
    """Pallas implementation of MCCLoss.forward (y_pred = logits, y_true in {0,1}).

    Streams the inputs in their native dtype (bf16 logits are supported end-to-end;
    the cast to f32 happens in VMEM inside the kernel).
    """
    n = y_pred.size
    lane_rem = n % _LANE
    rows_full = n // _LANE                 # number of rows that are entirely valid
    rows = _cdiv(n, _LANE)                 # logical rows of the (rows, 128) view

    # Two-TensorCore split whenever there is a non-trivial amount of work.
    n_split = 2 if rows >= 16 else 1
    tile_rows = min(_round_up(max_tile_rows, _SUBLANE),
                    _round_up(_cdiv(rows, n_split), _SUBLANE))
    nb = _cdiv(rows, tile_rows)            # logical blocks along the row axis
    inner = _cdiv(nb, n_split)
    grid = (n_split, inner)

    p = jnp.ravel(y_pred)
    t = jnp.ravel(y_true)

    # Only pad when strictly necessary: lane tail (n not multiple of 128) or a tiny
    # input smaller than one tile of rows.  Fill value is irrelevant (masked by the
    # true element count in-kernel).
    # TODO(synk): the lane-tail case still materializes one copy of each stream.
    rows_alloc = max(rows, tile_rows)
    total = rows_alloc * _LANE
    if total != n:
        p = jnp.pad(p, (0, total - n))
        t = jnp.pad(t, (0, total - n))
    p = p.reshape(rows_alloc, _LANE)
    t = t.reshape(rows_alloc, _LANE)

    kernel = _make_mcc_partials_kernel(tile_rows, inner, rows_full, lane_rem)

    # Clamp the block index so grid points beyond the last logical block re-read the
    # last block (their contribution is masked to zero in-kernel).
    def in_index_map(c, i):
        return (jnp.minimum(c * inner + i, nb - 1), 0)

    in_spec = pl.BlockSpec((tile_rows, _LANE), in_index_map)
    out_spec = pl.BlockSpec((3, _SUBLANE, _LANE), lambda c, i: (c, 0, 0))

    partials = pl.pallas_call(
        kernel,
        out_shape=jax.ShapeDtypeStruct((n_split * 3, _SUBLANE, _LANE), jnp.float32),
        grid=grid,
        in_specs=[in_spec, in_spec],
        out_specs=out_spec,
        compiler_params=pltpu.CompilerParams(
            dimension_semantics=("parallel", "arbitrary"),
            vmem_limit_bytes=32 * 1024 * 1024,
        ),
    )(p, t)

    # Tiny epilogue in plain JAX: reduce the (n_split, 3, 8, 128) partials and apply
    # the algebraic identity using the true element count.
    sums = jnp.sum(partials.reshape(n_split, 3, -1), axis=(0, 2))
    sum_p, sum_t, sum_pt = sums[0], sums[1], sums[2]
    n_f = jnp.asarray(n, jnp.float32)

    tp = sum_pt + eps
    fp = (sum_p - sum_pt) + eps
    fn = (sum_t - sum_pt) + eps
    tn = (n_f - sum_p - sum_t + sum_pt) + eps

    numerator = tp * tn - fp * fn
    denominator = jnp.sqrt((tp + fp) * (tp + fn) * (tn + fp) * (tn + fn))
    mcc = numerator / denominator
    return 1.0 - mcc


def _mcc_loss_ref(y_pred, y_true, eps: float = 1e-5):
    """Pure-JAX reference matching the PyTorch forward exactly."""
    p = jax.nn.sigmoid(y_pred.astype(jnp.float32)).reshape(-1)
    t = y_true.astype(jnp.float32).reshape(-1)
    tp = jnp.sum(p * t) + eps
    tn = jnp.sum((1 - p) * (1 - t)) + eps
    fp = jnp.sum(p * (1 - t)) + eps
    fn = jnp.sum((1 - p) * t) + eps
    num = tp * tn - fp * fn
    den = jnp.sqrt((tp + fp) * (tp + fn) * (tn + fp) * (tn + fn))
    return 1.0 - num / den


if __name__ == "__main__":
    key = jax.random.PRNGKey(0)
    mcc_jit = jax.jit(mcc_loss, static_argnames=("max_tile_rows",))

    # 1) Tiny segmentation-style input: single (partially valid) block.
    # 2) Ragged size: lane-tail pad + in-kernel row/lane masking, 2-core split.
    # 3) Aligned size: fully-valid fast path on both cores.
    # 4) Small max tile: multi-step accumulation + odd block count (index clamp path).
    cases = [
        ((2, 1, 16, 16), {}),
        ((2, 1, 33, 37), {}),
        ((2, 1, 64, 64), {}),
        ((2, 1, 44, 128), {"max_tile_rows": 8}),
    ]
    for shape, kwargs in cases:
        key, k1, k2 = jax.random.split(key, 3)
        y_pred = jax.random.normal(k1, shape, dtype=jnp.float32)
        y_true = (jax.random.uniform(k2, shape) > 0.5).astype(jnp.float32)

        loss = jax.block_until_ready(mcc_jit(y_pred, y_true, **kwargs))
        ref = jax.block_until_ready(_mcc_loss_ref(y_pred, y_true))
        assert jnp.allclose(loss, ref, atol=1e-5, rtol=1e-5), (shape, loss, ref)

    print("KERNEL_OK")
</pallas_src>

<mosaic_0001>
module attributes {stable_mosaic.version = 11 : i64} {
  func.func @kernel(%arg0: i32, %arg1: i32, %arg2: memref<8x128xf32, #tpu.memory_space<vmem>>, %arg3: memref<8x128xf32, #tpu.memory_space<vmem>>, %arg4: memref<3x8x128xf32, #tpu.memory_space<vmem>>) attributes {dimension_semantics = [#tpu.dimension_semantics<parallel>, #tpu.dimension_semantics<arbitrary>], iteration_bounds = array<i64: 1, 1>, scalar_prefetch = 0 : i64, scratch_operands = 0 : i64, tpu.core_type = #tpu.core_type<tc>, window_params = [{transform_indices = @transform_0, window_bounds = array<i64: 8, 128>}, {transform_indices = @transform_1, window_bounds = array<i64: 8, 128>}, {transform_indices = @transform_2, window_bounds = array<i64: 3, 8, 128>}]} {
    %c0_i32 = arith.constant 0 : i32
    %0 = arith.cmpi eq, %arg1, %c0_i32 : i32
    %1 = arith.extui %0 : i1 to i32
    %c0_i32_0 = arith.constant 0 : i32
    %2 = arith.cmpi ne, %1, %c0_i32_0 : i32
    scf.if %2 {
      %cst = arith.constant 0.000000e+00 : f32
      %13 = vector.broadcast %cst : f32 to vector<3x8x128xf32>
      %c0 = arith.constant 0 : index
      %c0_4 = arith.constant 0 : index
      %c0_5 = arith.constant 0 : index
      %14 = vector.load %arg4[%c0, %c0_4, %c0_5] : memref<3x8x128xf32, #tpu.memory_space<vmem>>, vector<3x8x128xf32>
      tpu.vector_store %arg4[%c0, %c0_4, %c0_5], %13 {strides = array<i32>} : memref<3x8x128xf32, #tpu.memory_space<vmem>>, vector<3x8x128xf32>,
    } else {
    }
    %c1_i32 = arith.constant 1 : i32
    %3 = arith.muli %arg0, %c1_i32 : i32
    %4 = arith.addi %3, %arg1 : i32
    %c8_i32 = arith.constant 8 : i32
    %5 = arith.muli %4, %c8_i32 : i32
    %c8_i32_1 = arith.constant 8 : i32
    %6 = arith.addi %5, %c8_i32_1 : i32
    %c4_i32 = arith.constant 4 : i32
    %7 = arith.cmpi sle, %6, %c4_i32 : i32
    %8 = arith.extui %7 : i1 to i32
    %c0_i32_2 = arith.constant 0 : i32
    %9 = arith.cmpi ne, %8, %c0_i32_2 : i32
    scf.if %9 {
      %c0 = arith.constant 0 : index
      %c0_4 = arith.constant 0 : index
      %13 = vector.load %arg2[%c0, %c0_4] : memref<8x128xf32, #tpu.memory_space<vmem>>, vector<8x128xf32>
      %14 = arith.negf %13 : vector<8x128xf32>
      %15 = math.exp %14 : vector<8x128xf32>
      %cst = arith.constant 1.000000e+00 : f32
      %16 = vector.broadcast %cst : f32 to vector<8x128xf32>
      %17 = arith.addf %16, %15 : vector<8x128xf32>
      %18 = arith.divf %16, %17 : vector<8x128xf32>
      %c0_5 = arith.constant 0 : index
      %c0_6 = arith.constant 0 : index
      %19 = vector.load %arg3[%c0_5, %c0_6] : memref<8x128xf32, #tpu.memory_space<vmem>>, vector<8x128xf32>
      %c0_7 = arith.constant 0 : index
      %c0_8 = arith.constant 0 : index
      %c0_9 = arith.constant 0 : index
      %20 = vector.load %arg4[%c0_7, %c0_8, %c0_9] : memref<3x8x128xf32, #tpu.memory_space<vmem>>, vector<1x8x128xf32>
      %21 = vector.shape_cast %20 : vector<1x8x128xf32> to vector<8x128xf32>
      %22 = vector.shape_cast %18 : vector<8x128xf32> to vector<1x8x128xf32>
      %cst_10 = arith.constant dense<0.000000e+00> : vector<8x128xf32>
      %23 = vector.multi_reduction <add>, %22, %cst_10 [0] : vector<1x8x128xf32> to vector<8x128xf32>
      %24 = arith.addf %21, %23 : vector<8x128xf32>
      %c0_11 = arith.constant 0 : index
      %c0_12 = arith.constant 0 : index
      %c0_13 = arith.constant 0 : index
      %25 = vector.load %arg4[%c0_11, %c0_12, %c0_13] : memref<3x8x128xf32, #tpu.memory_space<vmem>>, vector<1x8x128xf32>
      %26 = vector.shape_cast %25 : vector<1x8x128xf32> to vector<8x128xf32>
      %27 = vector.shape_cast %24 : vector<8x128xf32> to vector<1x8x128xf32>
      tpu.vector_store %arg4[%c0_11, %c0_12, %c0_13], %27 {strides = array<i32>} : memref<3x8x128xf32, #tpu.memory_space<vmem>>, vector<1x8x128xf32>,
      %c1 = arith.constant 1 : index
      %c0_14 = arith.constant 0 : index
      %c0_15 = arith.constant 0 : index
      %28 = vector.load %arg4[%c1, %c0_14, %c0_15] : memref<3x8x128xf32, #tpu.memory_space<vmem>>, vector<1x8x128xf32>
      %29 = vector.shape_cast %28 : vector<1x8x128xf32> to vector<8x128xf32>
      %30 = vector.shape_cast %19 : vector<8x128xf32> to vector<1x8x128xf32>
      %cst_16 = arith.constant dense<0.000000e+00> : vector<8x128xf32>
      %31 = vector.multi_reduction <add>, %30, %cst_16 [0] : vector<1x8x128xf32> to vector<8x128xf32>
      %32 = arith.addf %29, %31 : vector<8x128xf32>
      %c1_17 = arith.constant 1 : index
      %c0_18 = arith.constant 0 : index
      %c0_19 = arith.constant 0 : index
      %33 = vector.load %arg4[%c1_17, %c0_18, %c0_19] : memref<3x8x128xf32, #tpu.memory_space<vmem>>, vector<1x8x128xf32>
      %34 = vector.shape_cast %33 : vector<1x8x128xf32> to vector<8x128xf32>
      %35 = vector.shape_cast %32 : vector<8x128xf32> to vector<1x8x128xf32>
      tpu.vector_store %arg4[%c1_17, %c0_18, %c0_19], %35 {strides = array<i32>} : memref<3x8x128xf32, #tpu.memory_space<vmem>>, vector<1x8x128xf32>,
      %c2 = arith.constant 2 : index
      %c0_20 = arith.constant 0 : index
      %c0_21 = arith.constant 0 : index
      %36 = vector.load %arg4[%c2, %c0_20, %c0_21] : memref<3x8x128xf32, #tpu.memory_space<vmem>>, vector<1x8x128xf32>
      %37 = vector.shape_cast %36 : vector<1x8x128xf32> to vector<8x128xf32>
      %38 = arith.mulf %18, %19 : vector<8x128xf32>
      %39 = vector.shape_cast %38 : vector<8x128xf32> to vector<1x8x128xf32>
      %cst_22 = arith.constant dense<0.000000e+00> : vector<8x128xf32>
      %40 = vector.multi_reduction <add>, %39, %cst_22 [0] : vector<1x8x128xf32> to vector<8x128xf32>
      %41 = arith.addf %37, %40 : vector<8x128xf32>
      %c2_23 = arith.constant 2 : index
      %c0_24 = arith.constant 0 : index
      %c0_25 = arith.constant 0 : index
      %42 = vector.load %arg4[%c2_23, %c0_24, %c0_25] : memref<3x8x128xf32, #tpu.memory_space<vmem>>, vector<1x8x128xf32>
      %43 = vector.shape_cast %42 : vector<1x8x128xf32> to vector<8x128xf32>
      %44 = vector.shape_cast %41 : vector<8x128xf32> to vector<1x8x128xf32>
      tpu.vector_store %arg4[%c2_23, %c0_24, %c0_25], %44 {strides = array<i32>} : memref<3x8x128xf32, #tpu.memory_space<vmem>>, vector<1x8x128xf32>,
    } else {
    }
    %true = arith.constant true
    %10 = arith.xori %7, %true : i1
    %11 = arith.extui %10 : i1 to i32
    %c0_i32_3 = arith.constant 0 : i32
    %12 = arith.cmpi ne, %11, %c0_i32_3 : i32
    scf.if %12 {
      %13 = tpu.iota {dimensions = array<i32: 0>} : vector<8x128xi32>
      %14 = vector.broadcast %5 : i32 to vector<8x128xi32>
      %15 = arith.addi %14, %13 : vector<8x128xi32>
      %c4_i32_4 = arith.constant 4 : i32
      %16 = vector.broadcast %c4_i32_4 : i32 to vector<8x128xi32>
      %17 = arith.cmpi slt, %15, %16 : vector<8x128xi32>
      %c0 = arith.constant 0 : index
      %c0_5 = arith.constant 0 : index
      %18 = vector.load %arg2[%c0, %c0_5] : memref<8x128xf32, #tpu.memory_space<vmem>>, vector<8x128xf32>
      %19 = arith.negf %18 : vector<8x128xf32>
      %20 = math.exp %19 : vector<8x128xf32>
      %cst = arith.constant 1.000000e+00 : f32
      %21 = vector.broadcast %cst : f32 to vector<8x128xf32>
      %22 = arith.addf %21, %20 : vector<8x128xf32>
      %23 = arith.divf %21, %22 : vector<8x128xf32>
      %cst_6 = arith.constant 0.000000e+00 : f32
      %24 = vector.broadcast %cst_6 : f32 to vector<8x128xf32>
      %25 = arith.select %17, %23, %24 : vector<8x128xi1>, vector<8x128xf32>
      %c0_7 = arith.constant 0 : index
      %c0_8 = arith.constant 0 : index
      %26 = vector.load %arg3[%c0_7, %c0_8] : memref<8x128xf32, #tpu.memory_space<vmem>>, vector<8x128xf32>
      %cst_9 = arith.constant 0.000000e+00 : f32
      %27 = vector.broadcast %cst_9 : f32 to vector<8x128xf32>
      %28 = arith.select %17, %26, %27 : vector<8x128xi1>, vector<8x128xf32>
      %c0_10 = arith.constant 0 : index
      %c0_11 = arith.constant 0 : index
      %c0_12 = arith.constant 0 : index
      %29 = vector.load %arg4[%c0_10, %c0_11, %c0_12] : memref<3x8x128xf32, #tpu.memory_space<vmem>>, vector<1x8x128xf32>
      %30 = vector.shape_cast %29 : vector<1x8x128xf32> to vector<8x128xf32>
      %31 = vector.shape_cast %25 : vector<8x128xf32> to vector<1x8x128xf32>
      %cst_13 = arith.constant dense<0.000000e+00> : vector<8x128xf32>
      %32 = vector.multi_reduction <add>, %31, %cst_13 [0] : vector<1x8x128xf32> to vector<8x128xf32>
      %33 = arith.addf %30, %32 : vector<8x128xf32>
      %c0_14 = arith.constant 0 : index
      %c0_15 = arith.constant 0 : index
      %c0_16 = arith.constant 0 : index
      %34 = vector.load %arg4[%c0_14, %c0_15, %c0_16] : memref<3x8x128xf32, #tpu.memory_space<vmem>>, vector<1x8x128xf32>
      %35 = vector.shape_cast %34 : vector<1x8x128xf32> to vector<8x128xf32>
      %36 = vector.shape_cast %33 : vector<8x128xf32> to vector<1x8x128xf32>
      tpu.vector_store %arg4[%c0_14, %c0_15, %c0_16], %36 {strides = array<i32>} : memref<3x8x128xf32, #tpu.memory_space<vmem>>, vector<1x8x128xf32>,
      %c1 = arith.constant 1 : index
      %c0_17 = arith.constant 0 : index
      %c0_18 = arith.constant 0 : index
      %37 = vector.load %arg4[%c1, %c0_17, %c0_18] : memref<3x8x128xf32, #tpu.memory_space<vmem>>, vector<1x8x128xf32>
      %38 = vector.shape_cast %37 : vector<1x8x128xf32> to vector<8x128xf32>
      %39 = vector.shape_cast %28 : vector<8x128xf32> to vector<1x8x128xf32>
      %cst_19 = arith.constant dense<0.000000e+00> : vector<8x128xf32>
      %40 = vector.multi_reduction <add>, %39, %cst_19 [0] : vector<1x8x128xf32> to vector<8x128xf32>
      %41 = arith.addf %38, %40 : vector<8x128xf32>
      %c1_20 = arith.constant 1 : index
      %c0_21 = arith.constant 0 : index
      %c0_22 = arith.constant 0 : index
      %42 = vector.load %arg4[%c1_20, %c0_21, %c0_22] : memref<3x8x128xf32, #tpu.memory_space<vmem>>, vector<1x8x128xf32>
      %43 = vector.shape_cast %42 : vector<1x8x128xf32> to vector<8x128xf32>
      %44 = vector.shape_cast %41 : vector<8x128xf32> to vector<1x8x128xf32>
      tpu.vector_store %arg4[%c1_20, %c0_21, %c0_22], %44 {strides = array<i32>} : memref<3x8x128xf32, #tpu.memory_space<vmem>>, vector<1x8x128xf32>,
      %c2 = arith.constant 2 : index
      %c0_23 = arith.constant 0 : index
      %c0_24 = arith.constant 0 : index
      %45 = vector.load %arg4[%c2, %c0_23, %c0_24] : memref<3x8x128xf32, #tpu.memory_space<vmem>>, vector<1x8x128xf32>
      %46 = vector.shape_cast %45 : vector<1x8x128xf32> to vector<8x128xf32>
      %47 = arith.mulf %25, %28 : vector<8x128xf32>
      %48 = vector.shape_cast %47 : vector<8x128xf32> to vector<1x8x128xf32>
      %cst_25 = arith.constant dense<0.000000e+00> : vector<8x128xf32>
      %49 = vector.multi_reduction <add>, %48, %cst_25 [0] : vector<1x8x128xf32> to vector<8x128xf32>
      %50 = arith.addf %46, %49 : vector<8x128xf32>
      %c2_26 = arith.constant 2 : index
      %c0_27 = arith.constant 0 : index
      %c0_28 = arith.constant 0 : index
      %51 = vector.load %arg4[%c2_26, %c0_27, %c0_28] : memref<3x8x128xf32, #tpu.memory_space<vmem>>, vector<1x8x128xf32>
      %52 = vector.shape_cast %51 : vector<1x8x128xf32> to vector<8x128xf32>
      %53 = vector.shape_cast %50 : vector<8x128xf32> to vector<1x8x128xf32>
      tpu.vector_store %arg4[%c2_26, %c0_27, %c0_28], %53 {strides = array<i32>} : memref<3x8x128xf32, #tpu.memory_space<vmem>>, vector<1x8x128xf32>,
    } else {
    }
    return
  }
  func.func @transform_0(%arg0: i32, %arg1: i32) -> (i32, i32) {
    %c1_i32 = arith.constant 1 : i32
    %0 = arith.muli %arg0, %c1_i32 : i32
    %1 = arith.addi %0, %arg1 : i32
    %c0_i32 = arith.constant 0 : i32
    %2 = arith.minsi %1, %c0_i32 : i32
    %c0_i32_0 = arith.constant 0 : i32
    %c0_i32_1 = arith.constant 0 : i32
    return %2, %c0_i32_0 : i32, i32
  }
  func.func @transform_1(%arg0: i32, %arg1: i32) -> (i32, i32) {
    %c1_i32 = arith.constant 1 : i32
    %0 = arith.muli %arg0, %c1_i32 : i32
    %1 = arith.addi %0, %arg1 : i32
    %c0_i32 = arith.constant 0 : i32
    %2 = arith.minsi %1, %c0_i32 : i32
    %c0_i32_0 = arith.constant 0 : i32
    %c0_i32_1 = arith.constant 0 : i32
    return %2, %c0_i32_0 : i32, i32
  }
  func.func @transform_2(%arg0: i32, %arg1: i32) -> (i32, i32, i32) {
    %c0_i32 = arith.constant 0 : i32
    %c0_i32_0 = arith.constant 0 : i32
    %c0_i32_1 = arith.constant 0 : i32
    return %arg0, %c0_i32, %c0_i32_0 : i32, i32, i32
  }
}

</mosaic_0001>

<bundles_post_ra>
// kernel: mcc_loss.1
= control target key start
LH: loop header
LB: loop body
LE: loop exit
PB: predicated region body
PF: predicated region fallthrough
CT: control target
= control target key end

     0   :  { %v106_v0 = vlaneseq  ;;  %s197_s0 = inlined_call_operand.vmem [shape: f32[8,128], index: 0, kind: input, shape index: {}]   ;;  %s198_s1 = inlined_call_operand.vmem [shape: f32[8,128], index: 1, kind: input, shape index: {}]   ;;  %s199_s2 = inlined_call_operand.vmem [shape: f32[3,8,128], index: 2, kind: output, shape index: {}]  }
   0x1   :  { %v111_v1 = vld [vmem:[%s197_s0] sm:$0xff] }
   0x2   :  { %v107_v2 = vshrl.u32 %v106_v0, 7  ;;  %v157_v3 = vmul.f32 -1.442695, %v111_v1  ;;  %v119_v4 = vld [vmem:[%s198_s1] sm:$0xff] }
   0x4   :  { %vm110_vm0 = vcmp.lt.s32.totalorder %v107_v2, 4  ;;  %163 = vpow2.f32 %v157_v3 }
   0x5   :  { %v120_v5 = vsel %vm110_vm0, %v119_v4, 0.0 }
   0x6   :  { %159 = vst [vmem:[%s199_s2 + $0x8] sm:$0xff] %v120_v5 }
   0xe   :  { %v164_v6 = vpop.eup %163 }
   0xf   :  { %v115_v7 = vadd.f32 1.0, %v164_v6 }
  0x11   :  { %165 = vrcp.f32 %v115_v7 }
  0x1b   :  { %v166_v8 = vpop.eup %165 }
  0x1c   :  { %v118_v9 = vsel %vm110_vm0, %v166_v8, 0.0 }
  0x1d   :  { %v132_v10 = vmul.f32 %v120_v5, %v118_v9  ;;  %124 = vst [vmem:[%s199_s2] sm:$0xff] %v118_v9 }
  0x1f   :  { %161 = vst [vmem:[%s199_s2 + $0x10] sm:$0xff] %v132_v10 }

</bundles_post_ra>
